<compile_context>
chip_gen: v7x
topology: tpu7x:2x2x1
jax: 0.10.0
libtpu: 0.0.40
codegen_flags: <defaults>
</compile_context>

<pallas_src>
import functools

import jax
import jax.numpy as jnp
from jax.experimental import pallas as pl
from jax.experimental.pallas import tpu as pltpu

IN_FEATURES = 28 * 28   # 784
HIDDEN = 500
HIDDEN_PAD = 512        # 500 padded to a multiple of 128
CLASS_PAD = 128         # class dim padded to one full lane tile


def _round_up(x, m):
    return (x + m - 1) // m * m


def mlp_kernel(x_ref, w1_ref, b1_ref, w2_ref, b2_ref, o_ref):
    # x_ref : (TB, 784)   f32      w1_ref: (784, 512)  bf16   b1_ref: (1, 512) f32
    # w2_ref: (512, 128)  bf16     b2_ref: (1, 128)    f32    o_ref : (TB, 128) f32
    x = x_ref[...].astype(jnp.bfloat16)                       # cast in-kernel (no extra HBM pass)
    h = jnp.dot(x, w1_ref[...], preferred_element_type=jnp.float32)
    h = jnp.maximum(h + b1_ref[...], 0.0)                     # fc1 + bias (f32) + ReLU
    out = jnp.dot(h.astype(w2_ref.dtype), w2_ref[...],
                  preferred_element_type=jnp.float32)         # fc2
    o_ref[...] = (out + b2_ref[...]).astype(o_ref.dtype)


def prepare_params(params):
    """One-time prep outside the kernel:
       * pad hidden 500->512 with zeros,
       * pad the class dim to 128 with zeros (lane-dense output stores),
       * cast weights to bf16 (biases stay f32, added post-accumulation)."""
    w1, b1, w2, b2 = params
    num_classes = w2.shape[1]
    hpad = HIDDEN_PAD - w1.shape[1]
    cpad = CLASS_PAD - num_classes
    w1p = jnp.pad(w1, ((0, 0), (0, hpad))).astype(jnp.bfloat16)              # (784, 512)
    b1p = jnp.pad(b1, ((0, hpad),)).reshape(1, HIDDEN_PAD).astype(jnp.float32)
    w2p = jnp.pad(w2, ((0, hpad), (0, cpad))).astype(jnp.bfloat16)           # (512, 128)
    b2p = jnp.pad(b2, ((0, cpad),)).reshape(1, CLASS_PAD).astype(jnp.float32)
    return w1p, b1p, w2p, b2p, num_classes


def _choose_tile(B, block_b):
    """Batch tile: multiple of 8 (f32 sublane granule), capped at block_b,
    and split so the batch grid has >= 2 steps whenever there is more than
    one sublane-tile of work (keeps both v7x TensorCores busy)."""
    tb = min(block_b, _round_up(B, 8))
    if B > 8 and _round_up(B, tb) // tb < 2:
        tb = _round_up((B + 1) // 2, 8)
    return tb


@functools.partial(jax.jit, static_argnames=("num_classes", "block_b"))
def _forward_impl(x_nchw, w1p, b1p, w2p, b2p, num_classes, block_b):
    B = x_nchw.shape[0]

    # Same flatten as x.view(-1, 28*28); stays float32 (cast happens in-kernel).
    x2d = x_nchw.reshape(B, IN_FEATURES)

    tb = _choose_tile(B, block_b)
    b_pad = _round_up(B, tb)
    if b_pad != B:
        x2d = jnp.pad(x2d, ((0, b_pad - B), (0, 0)))

    grid = (b_pad // tb,)

    flops = 2 * b_pad * (IN_FEATURES * HIDDEN_PAD + HIDDEN_PAD * CLASS_PAD)
    bytes_accessed = (x2d.size * 4 + w1p.size * 2 + w2p.size * 2
                      + b1p.size * 4 + b2p.size * 4 + b_pad * CLASS_PAD * 4)

    out = pl.pallas_call(
        mlp_kernel,
        out_shape=jax.ShapeDtypeStruct((b_pad, CLASS_PAD), jnp.float32),
        grid=grid,
        in_specs=[
            pl.BlockSpec((tb, IN_FEATURES), lambda i: (i, 0)),          # x tile (pipelined)
            pl.BlockSpec((IN_FEATURES, HIDDEN_PAD), lambda i: (0, 0)),  # w1 resident
            pl.BlockSpec((1, HIDDEN_PAD), lambda i: (0, 0)),            # b1 resident
            pl.BlockSpec((HIDDEN_PAD, CLASS_PAD), lambda i: (0, 0)),    # w2 resident
            pl.BlockSpec((1, CLASS_PAD), lambda i: (0, 0)),             # b2 resident
        ],
        out_specs=pl.BlockSpec((tb, CLASS_PAD), lambda i: (i, 0)),
        compiler_params=pltpu.CompilerParams(
            dimension_semantics=("parallel",)),
        cost_estimate=pl.CostEstimate(
            flops=flops, transcendentals=0, bytes_accessed=bytes_accessed),
    )(x2d, w1p, b1p, w2p, b2p)

    return out[:B, :num_classes]


def mnist_net_forward(x_nchw, prepped, block_b=512):
    """x_nchw: (B, 1, 28, 28) float32 (NCHW, like PyTorch). Returns (B, C) f32."""
    w1p, b1p, w2p, b2p, num_classes = prepped
    return _forward_impl(x_nchw, w1p, b1p, w2p, b2p, num_classes, block_b)


def init_params(key, num_classes):
    """Matches PyTorch nn.Linear default init: U(-1/sqrt(fan_in), 1/sqrt(fan_in)).
    Weights stored as (in, out) so the kernel computes x @ W (== x @ W_pt.T)."""
    k1, k2, k3, k4 = jax.random.split(key, 4)
    bound1 = 1.0 / jnp.sqrt(float(IN_FEATURES))
    bound2 = 1.0 / jnp.sqrt(float(HIDDEN))
    w1 = jax.random.uniform(k1, (IN_FEATURES, HIDDEN), jnp.float32, -bound1, bound1)
    b1 = jax.random.uniform(k2, (HIDDEN,), jnp.float32, -bound1, bound1)
    w2 = jax.random.uniform(k3, (HIDDEN, num_classes), jnp.float32, -bound2, bound2)
    b2 = jax.random.uniform(k4, (num_classes,), jnp.float32, -bound2, bound2)
    return w1, b1, w2, b2


def reference_forward_f32(x_nchw, params):
    """Plain f32 JAX reference (exact module semantics)."""
    w1, b1, w2, b2 = params
    x = x_nchw.reshape(x_nchw.shape[0], IN_FEATURES)
    h = jnp.maximum(x @ w1 + b1, 0.0)
    return h @ w2 + b2


def reference_forward_bf16(x_nchw, params):
    """Reference emulating the kernel's bf16-input / f32-accumulate arithmetic."""
    w1, b1, w2, b2 = params
    x = x_nchw.reshape(x_nchw.shape[0], IN_FEATURES).astype(jnp.bfloat16)
    h = jnp.dot(x, w1.astype(jnp.bfloat16), preferred_element_type=jnp.float32) + b1
    h = jnp.maximum(h, 0.0)
    return jnp.dot(h.astype(jnp.bfloat16), w2.astype(jnp.bfloat16),
                   preferred_element_type=jnp.float32) + b2


if __name__ == "__main__":
    num_classes = 10
    batch = 2

    key = jax.random.PRNGKey(0)
    kx, kp = jax.random.split(key)
    x = jax.random.normal(kx, (batch, 1, 28, 28), dtype=jnp.float32)  # NCHW like PyTorch
    params = init_params(kp, num_classes)
    prepped = prepare_params(params)

    out = mnist_net_forward(x, prepped)
    out = jax.block_until_ready(out)
    assert out.shape == (batch, num_classes)

    # Tight check against a bf16-emulated reference, looser against pure f32.
    ref_bf16 = reference_forward_bf16(x, params)
    ref_f32 = reference_forward_f32(x, params)
    assert jnp.allclose(out, ref_bf16, atol=1e-2, rtol=1e-2), "mismatch vs bf16 reference"
    assert jnp.allclose(out, ref_f32, atol=5e-2, rtol=5e-2), "mismatch vs f32 reference"

    # Exercise the multi-step (megacore) batch path too.
    xb = jax.random.normal(kx, (300, 1, 28, 28), dtype=jnp.float32)
    outb = jax.block_until_ready(mnist_net_forward(xb, prepped))
    assert outb.shape == (300, num_classes)
    assert jnp.allclose(outb, reference_forward_bf16(xb, params), atol=1e-2, rtol=1e-2)

    print("KERNEL_OK")
</pallas_src>

<mosaic_0001>
module attributes {stable_mosaic.version = 11 : i64} {
  func.func @mlp_kernel(%arg0: i32, %arg1: memref<8x784xf32, #tpu.memory_space<vmem>>, %arg2: memref<784x512xbf16, #tpu.memory_space<vmem>>, %arg3: memref<1x512xf32, #tpu.memory_space<vmem>>, %arg4: memref<512x128xbf16, #tpu.memory_space<vmem>>, %arg5: memref<1x128xf32, #tpu.memory_space<vmem>>, %arg6: memref<8x128xf32, #tpu.memory_space<vmem>>) attributes {dimension_semantics = [#tpu.dimension_semantics<parallel>], iteration_bounds = array<i64: 1>, scalar_prefetch = 0 : i64, scratch_operands = 0 : i64, tpu.core_type = #tpu.core_type<tc>, window_params = [{transform_indices = @transform_0, window_bounds = array<i64: 8, 784>}, {pipeline_mode = #tpu.pipeline_mode<synchronous>, transform_indices = @transform_1, window_bounds = array<i64: 784, 512>}, {pipeline_mode = #tpu.pipeline_mode<synchronous>, transform_indices = @transform_2, window_bounds = array<i64: 1, 512>}, {pipeline_mode = #tpu.pipeline_mode<synchronous>, transform_indices = @transform_3, window_bounds = array<i64: 512, 128>}, {pipeline_mode = #tpu.pipeline_mode<synchronous>, transform_indices = @transform_4, window_bounds = array<i64: 1, 128>}, {transform_indices = @transform_5, window_bounds = array<i64: 8, 128>}]} {
    %c0 = arith.constant 0 : index
    %c0_0 = arith.constant 0 : index
    %0 = vector.load %arg1[%c0, %c0_0] : memref<8x784xf32, #tpu.memory_space<vmem>>, vector<8x784xf32>
    %1 = arith.truncf %0 : vector<8x784xf32> to vector<8x784xbf16>
    %c0_1 = arith.constant 0 : index
    %c0_2 = arith.constant 0 : index
    %2 = vector.load %arg2[%c0_1, %c0_2] : memref<784x512xbf16, #tpu.memory_space<vmem>>, vector<784x512xbf16>
    %cst = arith.constant dense<0.000000e+00> : vector<8x512xf32>
    %3 = tpu.matmul %1, %2, %cst {dimension_numbers = #tpu.dot_dimension_numbers<[1], [0], [0], [1], [0, 0, 1, 1], [], []>} : vector<8x784xbf16>, vector<784x512xbf16>, vector<8x512xf32> -> vector<8x512xf32>
    %c0_3 = arith.constant 0 : index
    %c0_4 = arith.constant 0 : index
    %4 = vector.load %arg3[%c0_3, %c0_4] : memref<1x512xf32, #tpu.memory_space<vmem>>, vector<1x512xf32>
    %5 = vector.broadcast %4 : vector<1x512xf32> to vector<8x512xf32>
    %6 = arith.addf %3, %5 : vector<8x512xf32>
    %cst_5 = arith.constant 0.000000e+00 : f32
    %7 = vector.broadcast %cst_5 : f32 to vector<8x512xf32>
    %8 = arith.maximumf %6, %7 : vector<8x512xf32>
    %9 = arith.truncf %8 : vector<8x512xf32> to vector<8x512xbf16>
    %c0_6 = arith.constant 0 : index
    %c0_7 = arith.constant 0 : index
    %10 = vector.load %arg4[%c0_6, %c0_7] : memref<512x128xbf16, #tpu.memory_space<vmem>>, vector<512x128xbf16>
    %cst_8 = arith.constant dense<0.000000e+00> : vector<8x128xf32>
    %11 = tpu.matmul %9, %10, %cst_8 {dimension_numbers = #tpu.dot_dimension_numbers<[1], [0], [0], [1], [0, 0, 1, 1], [], []>} : vector<8x512xbf16>, vector<512x128xbf16>, vector<8x128xf32> -> vector<8x128xf32>
    %c0_9 = arith.constant 0 : index
    %c0_10 = arith.constant 0 : index
    %12 = vector.load %arg5[%c0_9, %c0_10] : memref<1x128xf32, #tpu.memory_space<vmem>>, vector<1x128xf32>
    %13 = vector.broadcast %12 : vector<1x128xf32> to vector<8x128xf32>
    %14 = arith.addf %11, %13 : vector<8x128xf32>
    %c0_11 = arith.constant 0 : index
    %c0_12 = arith.constant 0 : index
    %15 = vector.load %arg6[%c0_11, %c0_12] : memref<8x128xf32, #tpu.memory_space<vmem>>, vector<8x128xf32>
    tpu.vector_store %arg6[%c0_11, %c0_12], %14 {strides = array<i32>} : memref<8x128xf32, #tpu.memory_space<vmem>>, vector<8x128xf32>,
    return
  }
  func.func @transform_0(%arg0: i32) -> (i32, i32) {
    %c0_i32 = arith.constant 0 : i32
    %c0_i32_0 = arith.constant 0 : i32
    return %arg0, %c0_i32 : i32, i32
  }
  func.func @transform_1(%arg0: i32) -> (i32, i32) {
    %c0_i32 = arith.constant 0 : i32
    %c0_i32_0 = arith.constant 0 : i32
    %c0_i32_1 = arith.constant 0 : i32
    return %c0_i32, %c0_i32_0 : i32, i32
  }
  func.func @transform_2(%arg0: i32) -> (i32, i32) {
    %c0_i32 = arith.constant 0 : i32
    %c0_i32_0 = arith.constant 0 : i32
    %c0_i32_1 = arith.constant 0 : i32
    return %c0_i32, %c0_i32_0 : i32, i32
  }
  func.func @transform_3(%arg0: i32) -> (i32, i32) {
    %c0_i32 = arith.constant 0 : i32
    %c0_i32_0 = arith.constant 0 : i32
    %c0_i32_1 = arith.constant 0 : i32
    return %c0_i32, %c0_i32_0 : i32, i32
  }
  func.func @transform_4(%arg0: i32) -> (i32, i32) {
    %c0_i32 = arith.constant 0 : i32
    %c0_i32_0 = arith.constant 0 : i32
    %c0_i32_1 = arith.constant 0 : i32
    return %c0_i32, %c0_i32_0 : i32, i32
  }
  func.func @transform_5(%arg0: i32) -> (i32, i32) {
    %c0_i32 = arith.constant 0 : i32
    %c0_i32_0 = arith.constant 0 : i32
    return %arg0, %c0_i32 : i32, i32
  }
}

</mosaic_0001>

<bundles_post_ra>
// kernel: _forward_impl.1
= control target key start
LH: loop header
LB: loop body
LE: loop exit
PB: predicated region body
PF: predicated region fallthrough
CT: control target
= control target key end

     0   :  { %10 = vsyncpa [#allocation3], 0  ;;  %s2593_s18 = smov [#allocation2]   ;;  %s2765_s0 = inlined_call_operand.vmem [shape: f32[8,784], index: 0, kind: input, shape index: {}]   ;;  %s2766_s1 = inlined_call_operand.hbm [shape: bf16[784,512], index: 1, kind: input, shape index: {}]   ;;  %s2767_s2 = inlined_call_operand.vmem [shape: f32[1,512], index: 2, kind: input, shape index: {}]   ;;  %s2768_s3 = inlined_call_operand.vmem [shape: bf16[512,128], index: 3, kind: input, shape index: {}]   ;;  %s2769_s4 = inlined_call_operand.vmem [shape: f32[1,128], index: 4, kind: input, shape index: {}]   ;;  %s2770_s5 = inlined_call_operand.vmem [shape: f32[8,128], index: 5, kind: output, shape index: {}]  }
   0x1   :  { %s18_s19 = sshll.u32 %s2593_s18, 4  ;;  %s2569_s22 = scalar_lea.hbm %s2766_s1, 25088  ;;  %s19_s19 = int_to_ptr.vmem [resolvable:$true] %s18_s19 }
   0x2   :  { %p2570_p0 = scmp.ne.s32.totalorder %s2766_s1, %s2569_s22  ;;  %p2573_p1 = scmp.lt.u32.totalorder %s2569_s22, %s2766_s1 }
   0x4   :  { %p2575_p2 = pnand %p2573_p1, %p2570_p0 }
   0x6   :  { %2578 = shalt.err (!%p2575_p2)
}
   0x7   :  { %s2579_s27 = scalar_lea.vmem %s19_s19, 25088  ;;  %p2584_p4 = scmp.lt.s32.totalorder %s19_s19, %s19_s19 }
   0x8   :  { %p2580_p3 = scmp.ne.s32.totalorder %s19_s19, %s2579_s27  ;;  %p2585_p5 = scmp.lt.s32.totalorder %s2579_s27, %s2579_s27 }
   0xa   :  { %p2586_p6 = por %p2585_p5, %p2584_p4 }
   0xc   :  { %p2587_p7 = pnand %p2586_p6, %p2580_p3 }
   0xe   :  { %2590 = shalt.err (!%p2587_p7)
}
   0xf   :  { %s2594_s28 = smov 256   ;;  %s2595_s29 = smov 16  }
  0x10   :  { %24 = dma.hbm_to_vmem [thread:$0]  %s2766_s1, 25088, %s19_s19, [#allocation3], %s2594_s28, %s2594_s28, %s2595_s29  }
  0x11   :  { %2591 = dma.done.wait [#allocation3], 25088  }
  0x12   :  { %2592 = vsyncadd [#allocation3], 4294942208  ;;  %v2243_v0 = vld [vmem:[#allocation2 + $0x4] ss:$16 sps:$4 sm:$0xff]   ;;  %v2245_v1 = vld [vmem:[#allocation2 + $0xc] ss:$16 sps:$4 sm:$0xff]  }
  0x13   :  { %1251 = vmatprep.subr.bf16.mxu0 %v2243_v0  ;;  %v2247_v2 = vld [vmem:[#allocation2] ss:$16 sps:$4 sm:$0xff]   ;;  %v2248_v3 = vld [vmem:[#allocation2 + $0x8] ss:$16 sps:$4 sm:$0xff]   ;;  %1415 = vmatprep.subr.bf16.mxu1 %v2245_v1  ;;  %v2249_v4 = vld [vmem:[#allocation2 + $0x24] ss:$16 sps:$4 sm:$0xff]  }
  0x14   :  { %1252 = vmatpush1.bf16.msra.mxu0 %v2247_v2  ;;  %1416 = vmatpush1.bf16.msra.mxu1 %v2248_v3  ;;  %v2251_v5 = vld [vmem:[#allocation2 + $0x2c] ss:$16 sps:$4 sm:$0xff]   ;;  %v2253_v6 = vld [vmem:[#allocation2 + $0x20] ss:$16 sps:$4 sm:$0xff]   ;;  %v2254_v7 = vld [vmem:[#allocation2 + $0x28] ss:$16 sps:$4 sm:$0xff]  }
  0x15   :  { %1253 = vmatprep.subr.bf16.mxu0 %v2249_v4  ;;  %1417 = vmatprep.subr.bf16.mxu1 %v2251_v5  ;;  %v2255_v8 = vld [vmem:[#allocation2 + $0x44] ss:$16 sps:$4 sm:$0xff]   ;;  %v2257_v9 = vld [vmem:[#allocation2 + $0x4c] ss:$16 sps:$4 sm:$0xff]   ;;  %v2259_v10 = vld [vmem:[#allocation2 + $0x40] ss:$16 sps:$4 sm:$0xff]  }
  0x16   :  { %v2260_v11 = vld [vmem:[#allocation2 + $0x48] ss:$16 sps:$4 sm:$0xff]   ;;  %v2261_v12 = vld [vmem:[#allocation2 + $0x64] ss:$16 sps:$4 sm:$0xff]   ;;  %v2263_v13 = vld [vmem:[#allocation2 + $0x6c] ss:$16 sps:$4 sm:$0xff]  }
  0x17   :  { %v2265_v14 = vld [vmem:[#allocation2 + $0x60] ss:$16 sps:$4 sm:$0xff]   ;;  %v2266_v15 = vld [vmem:[#allocation2 + $0x68] ss:$16 sps:$4 sm:$0xff]   ;;  %v2267_v16 = vld [vmem:[#allocation2 + $0x84] ss:$16 sps:$4 sm:$0xff]  }
  0x18   :  { %1254 = vmatpush1.bf16.msra.mxu0 %v2253_v6  ;;  %1418 = vmatpush1.bf16.msra.mxu1 %v2254_v7  ;;  %v2269_v17 = vld [vmem:[#allocation2 + $0x8c] ss:$16 sps:$4 sm:$0xff]   ;;  %v2271_v18 = vld [vmem:[#allocation2 + $0x80] ss:$16 sps:$4 sm:$0xff]   ;;  %v2272_v19 = vld [vmem:[#allocation2 + $0x88] ss:$16 sps:$4 sm:$0xff]  }
  0x19   :  { %1255 = vmatprep.subr.bf16.mxu0 %v2255_v8  ;;  %1419 = vmatprep.subr.bf16.mxu1 %v2257_v9  ;;  %v2273_v20 = vld [vmem:[#allocation2 + $0xa4] ss:$16 sps:$4 sm:$0xff]   ;;  %v2275_v21 = vld [vmem:[#allocation2 + $0xac] ss:$16 sps:$4 sm:$0xff]   ;;  %v2277_v22 = vld [vmem:[#allocation2 + $0xa0] ss:$16 sps:$4 sm:$0xff]  }
  0x1a   :  { %v2278_v23 = vld [vmem:[#allocation2 + $0xa8] ss:$16 sps:$4 sm:$0xff]   ;;  %v2279_v24 = vld [vmem:[#allocation2 + $0xc4] ss:$16 sps:$4 sm:$0xff]   ;;  %v2281_v25 = vld [vmem:[#allocation2 + $0xcc] ss:$16 sps:$4 sm:$0xff]  }
  0x1b   :  { %v2283_v26 = vld [vmem:[#allocation2 + $0xc0] ss:$16 sps:$4 sm:$0xff]   ;;  %v2284_v27 = vld [vmem:[#allocation2 + $0xc8] ss:$16 sps:$4 sm:$0xff]   ;;  %v2285_v28 = vld [vmem:[#allocation2 + $0xe4] ss:$16 sps:$4 sm:$0xff]  }
  0x1c   :  { %1256 = vmatpush1.bf16.msra.mxu0 %v2259_v10  ;;  %1420 = vmatpush1.bf16.msra.mxu1 %v2260_v11  ;;  %v2287_v29 = vld [vmem:[#allocation2 + $0xec] ss:$16 sps:$4 sm:$0xff]   ;;  %v2289_v30 = vld [vmem:[#allocation2 + $0xe0] ss:$16 sps:$4 sm:$0xff]   ;;  %v2290_v31 = vld [vmem:[#allocation2 + $0xe8] ss:$16 sps:$4 sm:$0xff]  }
  0x1d   :  { %1257 = vmatprep.subr.bf16.mxu0 %v2261_v12  ;;  %1421 = vmatprep.subr.bf16.mxu1 %v2263_v13  ;;  %v2291_v32 = vld [vmem:[#allocation2 + $0x104] ss:$16 sps:$4 sm:$0xff]   ;;  %v2293_v33 = vld [vmem:[#allocation2 + $0x10c] ss:$16 sps:$4 sm:$0xff]   ;;  %v2295_v34 = vld [vmem:[#allocation2 + $0x100] ss:$16 sps:$4 sm:$0xff]  }
  0x1e   :  { %v2296_v35 = vld [vmem:[#allocation2 + $0x108] ss:$16 sps:$4 sm:$0xff]   ;;  %v2297_v36 = vld [vmem:[#allocation2 + $0x124] ss:$16 sps:$4 sm:$0xff]   ;;  %v2299_v37 = vld [vmem:[#allocation2 + $0x12c] ss:$16 sps:$4 sm:$0xff]  }
  0x1f   :  { %v2301_v38 = vld [vmem:[#allocation2 + $0x120] ss:$16 sps:$4 sm:$0xff]   ;;  %v2302_v39 = vld [vmem:[#allocation2 + $0x128] ss:$16 sps:$4 sm:$0xff]   ;;  %v2303_v40 = vld [vmem:[#allocation2 + $0x144] ss:$16 sps:$4 sm:$0xff]  }
  0x20   :  { %1258 = vmatpush1.bf16.msra.mxu0 %v2265_v14  ;;  %1422 = vmatpush1.bf16.msra.mxu1 %v2266_v15  ;;  %v2305_v41 = vld [vmem:[#allocation2 + $0x14c] ss:$16 sps:$4 sm:$0xff]   ;;  %v2307_v42 = vld [vmem:[#allocation2 + $0x140] ss:$16 sps:$4 sm:$0xff]   ;;  %v2308_v43 = vld [vmem:[#allocation2 + $0x148] ss:$16 sps:$4 sm:$0xff]  }
  0x21   :  { %1259 = vmatprep.subr.bf16.mxu0 %v2267_v16  ;;  %1423 = vmatprep.subr.bf16.mxu1 %v2269_v17  ;;  %v2309_v44 = vld [vmem:[#allocation2 + $0x164] ss:$16 sps:$4 sm:$0xff]   ;;  %v2311_v45 = vld [vmem:[#allocation2 + $0x16c] ss:$16 sps:$4 sm:$0xff]   ;;  %v2313_v47 = vld [vmem:[#allocation2 + $0x160] ss:$16 sps:$4 sm:$0xff]  }
  0x22   :  { %v36_v46 = vld [vmem:[%s2765_s0 + $0x8] sm:$0xff]  ;;  %v2315_v50 = vld [vmem:[#allocation2 + $0x184] ss:$16 sps:$4 sm:$0xff]   ;;  %v2319_v52 = vld [vmem:[#allocation2 + $0x180] ss:$16 sps:$4 sm:$0xff]   ;;  %vm1247_vm0 = vcmask 130048  }
  0x23   :  { %v43_v48 = vpack.c.bf16 %v36_v46, %v36_v46  ;;  %v2314_v49 = vld [vmem:[#allocation2 + $0x168] ss:$16 sps:$4 sm:$0xff]   ;;  %v2317_v51 = vld [vmem:[#allocation2 + $0x18c] ss:$16 sps:$4 sm:$0xff]   ;;  %v2321_v54 = vld [vmem:[#allocation2 + $0x1a4] ss:$16 sps:$4 sm:$0xff]  }
  0x24   :  { %1260 = vmatpush1.bf16.msra.mxu0 %v2271_v18  ;;  %1424 = vmatpush1.bf16.msra.mxu1 %v2272_v19  ;;  %v2320_v53 = vld [vmem:[#allocation2 + $0x188] ss:$16 sps:$4 sm:$0xff]   ;;  %v2323_v55 = vld [vmem:[#allocation2 + $0x1ac] ss:$16 sps:$4 sm:$0xff]   ;;  %v2325_v56 = vld [vmem:[#allocation2 + $0x1a0] ss:$16 sps:$4 sm:$0xff]  }
  0x25   :  { %1261 = vmatprep.subr.bf16.mxu0 %v2273_v20  ;;  %1425 = vmatprep.subr.bf16.mxu1 %v2275_v21  ;;  %v2326_v57 = vld [vmem:[#allocation2 + $0x1a8] ss:$16 sps:$4 sm:$0xff]   ;;  %v2327_v58 = vld [vmem:[#allocation2 + $0x1c4] ss:$16 sps:$4 sm:$0xff]   ;;  %v2329_v59 = vld [vmem:[#allocation2 + $0x1cc] ss:$16 sps:$4 sm:$0xff]  }
  0x26   :  { %1283 = vmatprep.mubr.bf16.mxu0 %v43_v48  ;;  %1447 = vmatprep.mubr.bf16.mxu1 %v43_v48  ;;  %v2331_v60 = vld [vmem:[#allocation2 + $0x1c0] ss:$16 sps:$4 sm:$0xff]   ;;  %v2332_v61 = vld [vmem:[#allocation2 + $0x1c8] ss:$16 sps:$4 sm:$0xff]   ;;  %v2333_v62 = vld [vmem:[#allocation2 + $0x1e4] ss:$16 sps:$4 sm:$0xff]  }
  0x27   :  { %v2335_v63 = vld [vmem:[#allocation2 + $0x1ec] ss:$16 sps:$4 sm:$0xff]   ;;  %v2337_v0 = vld [vmem:[#allocation2 + $0x1e0] ss:$16 sps:$4 sm:$0xff]   ;;  %v2338_v1 = vld [vmem:[#allocation2 + $0x1e8] ss:$16 sps:$4 sm:$0xff]  }
  0x28   :  { %1262 = vmatpush1.bf16.msra.mxu0 %v2277_v22  ;;  %1426 = vmatpush1.bf16.msra.mxu1 %v2278_v23  ;;  %v35_v2 = vld [vmem:[%s2765_s0] sm:$0xff]  ;;  %v2344_v4 = vld [vmem:[#allocation2 + $0x20c] ss:$16 sps:$4 sm:$0xff]   ;;  %v2342_v7 = vld [vmem:[#allocation2 + $0x208] ss:$16 sps:$4 sm:$0xff]  }
  0x29   :  { %1263 = vmatprep.subr.bf16.mxu0 %v2279_v24  ;;  %1427 = vmatprep.subr.bf16.mxu1 %v2281_v25  ;;  %v2341_v3 = vld [vmem:[#allocation2 + $0x204] ss:$16 sps:$4 sm:$0xff]   ;;  %v42_v5 = vpack.c.bf16 %v35_v2, %v35_v2  ;;  %v2339_v6 = vld [vmem:[#allocation2 + $0x200] ss:$16 sps:$4 sm:$0xff]   ;;  %v2350_v9 = vld [vmem:[#allocation2 + $0x22c] ss:$16 sps:$4 sm:$0xff]  }
  0x2a   :  { %v2347_v8 = vld [vmem:[#allocation2 + $0x224] ss:$16 sps:$4 sm:$0xff]   ;;  %v2345_v10 = vld [vmem:[#allocation2 + $0x220] ss:$16 sps:$4 sm:$0xff]   ;;  %v2348_v11 = vld [vmem:[#allocation2 + $0x228] ss:$16 sps:$4 sm:$0xff]  }
  0x2b   :  { %v2353_v12 = vld [vmem:[#allocation2 + $0x244] ss:$16 sps:$4 sm:$0xff]   ;;  %v2356_v13 = vld [vmem:[#allocation2 + $0x24c] ss:$16 sps:$4 sm:$0xff]   ;;  %v2351_v14 = vld [vmem:[#allocation2 + $0x240] ss:$16 sps:$4 sm:$0xff]  }
  0x2c   :  { %1264 = vmatpush1.bf16.msra.mxu0 %v2283_v26  ;;  %1428 = vmatpush1.bf16.msra.mxu1 %v2284_v27  ;;  %v2354_v15 = vld [vmem:[#allocation2 + $0x248] ss:$16 sps:$4 sm:$0xff]   ;;  %v2359_v16 = vld [vmem:[#allocation2 + $0x264] ss:$16 sps:$4 sm:$0xff]   ;;  %v2362_v17 = vld [vmem:[#allocation2 + $0x26c] ss:$16 sps:$4 sm:$0xff]  }
  0x2d   :  { %1265 = vmatprep.subr.bf16.mxu0 %v2285_v28  ;;  %1429 = vmatprep.subr.bf16.mxu1 %v2287_v29  ;;  %v2357_v18 = vld [vmem:[#allocation2 + $0x260] ss:$16 sps:$4 sm:$0xff]   ;;  %v2360_v19 = vld [vmem:[#allocation2 + $0x268] ss:$16 sps:$4 sm:$0xff]   ;;  %v2365_v20 = vld [vmem:[#allocation2 + $0x284] ss:$16 sps:$4 sm:$0xff]  }
  0x2e   :  { %v2368_v21 = vld [vmem:[#allocation2 + $0x28c] ss:$16 sps:$4 sm:$0xff]   ;;  %v2363_v22 = vld [vmem:[#allocation2 + $0x280] ss:$16 sps:$4 sm:$0xff]   ;;  %v2366_v23 = vld [vmem:[#allocation2 + $0x288] ss:$16 sps:$4 sm:$0xff]  }
  0x2f   :  { %v2371_v24 = vld [vmem:[#allocation2 + $0x2a4] ss:$16 sps:$4 sm:$0xff]   ;;  %v2374_v25 = vld [vmem:[#allocation2 + $0x2ac] ss:$16 sps:$4 sm:$0xff]   ;;  %v2369_v26 = vld [vmem:[#allocation2 + $0x2a0] ss:$16 sps:$4 sm:$0xff]  }
  0x30   :  { %1266 = vmatpush1.bf16.msra.mxu0 %v2289_v30  ;;  %1430 = vmatpush1.bf16.msra.mxu1 %v2290_v31  ;;  %v2372_v27 = vld [vmem:[#allocation2 + $0x2a8] ss:$16 sps:$4 sm:$0xff]   ;;  %v2377_v28 = vld [vmem:[#allocation2 + $0x2c4] ss:$16 sps:$4 sm:$0xff]   ;;  %v2380_v29 = vld [vmem:[#allocation2 + $0x2cc] ss:$16 sps:$4 sm:$0xff]  }
  0x31   :  { %1267 = vmatprep.subr.bf16.mxu0 %v2291_v32  ;;  %1431 = vmatprep.subr.bf16.mxu1 %v2293_v33  ;;  %v38_v30 = vld [vmem:[%s2765_s0 + $0x18] sm:$0xff]  ;;  %v2375_v31 = vld [vmem:[#allocation2 + $0x2c0] ss:$16 sps:$4 sm:$0xff]   ;;  %v2401_v46 = vld [vmem:[#allocation2 + $0x344] ss:$16 sps:$4 sm:$0xff]  }
  0x32   :  { %v45_v32 = vpack.c.bf16 %v38_v30, %v38_v30  ;;  %v2378_v33 = vld [vmem:[#allocation2 + $0x2c8] ss:$16 sps:$4 sm:$0xff]   ;;  %v2399_v48 = vld [vmem:[#allocation2 + $0x340] ss:$16 sps:$4 sm:$0xff]   ;;  %v2431_v2 = vld [vmem:[#allocation2 + $0x3e4] ss:$16 sps:$4 sm:$0xff]  }
  0x33   :  { %v2467_v30 = vld [vmem:[#allocation2 + $0x4a4] ss:$16 sps:$4 sm:$0xff]  }
  0x34   :  { %1268 = vmatpush1.bf16.msra.mxu0 %v2295_v34  ;;  %1432 = vmatpush1.bf16.msra.mxu1 %v2296_v35  ;;  %v2383_v34 = vld [vmem:[#allocation2 + $0x2e4] ss:$16 sps:$4 sm:$0xff]   ;;  %v2386_v35 = vld [vmem:[#allocation2 + $0x2ec] ss:$16 sps:$4 sm:$0xff]  }
  0x35   :  { %1269 = vmatprep.subr.bf16.mxu0 %v2297_v36  ;;  %1433 = vmatprep.subr.bf16.mxu1 %v2299_v37  ;;  %v2381_v36 = vld [vmem:[#allocation2 + $0x2e0] ss:$16 sps:$4 sm:$0xff]   ;;  %v2384_v37 = vld [vmem:[#allocation2 + $0x2e8] ss:$16 sps:$4 sm:$0xff]  }
  0x38   :  { %1270 = vmatpush1.bf16.msra.mxu0 %v2301_v38  ;;  %1434 = vmatpush1.bf16.msra.mxu1 %v2302_v39  ;;  %v2389_v38 = vld [vmem:[#allocation2 + $0x304] ss:$16 sps:$4 sm:$0xff]   ;;  %v2392_v39 = vld [vmem:[#allocation2 + $0x30c] ss:$16 sps:$4 sm:$0xff]  }
  0x39   :  { %1271 = vmatprep.subr.bf16.mxu0 %v2303_v40  ;;  %1435 = vmatprep.subr.bf16.mxu1 %v2305_v41  ;;  %v2387_v40 = vld [vmem:[#allocation2 + $0x300] ss:$16 sps:$4 sm:$0xff]   ;;  %v2390_v41 = vld [vmem:[#allocation2 + $0x308] ss:$16 sps:$4 sm:$0xff]  }
  0x3c   :  { %1272 = vmatpush1.bf16.msra.mxu0 %v2307_v42  ;;  %1436 = vmatpush1.bf16.msra.mxu1 %v2308_v43  ;;  %v2395_v42 = vld [vmem:[#allocation2 + $0x324] ss:$16 sps:$4 sm:$0xff]   ;;  %v2398_v43 = vld [vmem:[#allocation2 + $0x32c] ss:$16 sps:$4 sm:$0xff]  }
  0x3d   :  { %1273 = vmatprep.subr.bf16.mxu0 %v2309_v44  ;;  %1437 = vmatprep.subr.bf16.mxu1 %v2311_v45  ;;  %v2393_v44 = vld [vmem:[#allocation2 + $0x320] ss:$16 sps:$4 sm:$0xff]   ;;  %v2396_v45 = vld [vmem:[#allocation2 + $0x328] ss:$16 sps:$4 sm:$0xff]  }
  0x40   :  { %1274 = vmatpush1.bf16.msra.mxu0 %v2313_v47  ;;  %1438 = vmatpush1.bf16.msra.mxu1 %v2314_v49  ;;  %v2404_v47 = vld [vmem:[#allocation2 + $0x34c] ss:$16 sps:$4 sm:$0xff]   ;;  %v2402_v49 = vld [vmem:[#allocation2 + $0x348] ss:$16 sps:$4 sm:$0xff]  }
  0x41   :  { %1275 = vmatprep.subr.bf16.mxu0 %v2315_v50  ;;  %1439 = vmatprep.subr.bf16.mxu1 %v2317_v51  ;;  %v2407_v50 = vld [vmem:[#allocation2 + $0x364] ss:$16 sps:$4 sm:$0xff]   ;;  %v2410_v51 = vld [vmem:[#allocation2 + $0x36c] ss:$16 sps:$4 sm:$0xff]  }
  0x44   :  { %1276 = vmatpush1.bf16.msra.mxu0 %v2319_v52  ;;  %1440 = vmatpush1.bf16.msra.mxu1 %v2320_v53  ;;  %v2405_v52 = vld [vmem:[#allocation2 + $0x360] ss:$16 sps:$4 sm:$0xff]   ;;  %v2408_v53 = vld [vmem:[#allocation2 + $0x368] ss:$16 sps:$4 sm:$0xff]  }
  0x45   :  { %1277 = vmatprep.subr.bf16.mxu0 %v2321_v54  ;;  %1441 = vmatprep.subr.bf16.mxu1 %v2323_v55  ;;  %v2413_v54 = vld [vmem:[#allocation2 + $0x384] ss:$16 sps:$4 sm:$0xff]   ;;  %v2416_v55 = vld [vmem:[#allocation2 + $0x38c] ss:$16 sps:$4 sm:$0xff]  }
  0x48   :  { %1278 = vmatpush1.bf16.msra.mxu0 %v2325_v56  ;;  %1442 = vmatpush1.bf16.msra.mxu1 %v2326_v57  ;;  %v2411_v56 = vld [vmem:[#allocation2 + $0x380] ss:$16 sps:$4 sm:$0xff]   ;;  %v2414_v57 = vld [vmem:[#allocation2 + $0x388] ss:$16 sps:$4 sm:$0xff]  }
  0x49   :  { %1279 = vmatprep.subr.bf16.mxu0 %v2327_v58  ;;  %1443 = vmatprep.subr.bf16.mxu1 %v2329_v59  ;;  %v2419_v58 = vld [vmem:[#allocation2 + $0x3a4] ss:$16 sps:$4 sm:$0xff]   ;;  %v2422_v59 = vld [vmem:[#allocation2 + $0x3ac] ss:$16 sps:$4 sm:$0xff]  }
  0x4c   :  { %1280 = vmatpush1.bf16.msra.mxu0 %v2331_v60  ;;  %1444 = vmatpush1.bf16.msra.mxu1 %v2332_v61  ;;  %v2417_v60 = vld [vmem:[#allocation2 + $0x3a0] ss:$16 sps:$4 sm:$0xff]   ;;  %v2420_v61 = vld [vmem:[#allocation2 + $0x3a8] ss:$16 sps:$4 sm:$0xff]  }
  0x4d   :  { %1281 = vmatprep.subr.bf16.mxu0 %v2333_v62  ;;  %1445 = vmatprep.subr.bf16.mxu1 %v2335_v63  ;;  %v2425_v62 = vld [vmem:[#allocation2 + $0x3c4] ss:$16 sps:$4 sm:$0xff]   ;;  %v2428_v63 = vld [vmem:[#allocation2 + $0x3cc] ss:$16 sps:$4 sm:$0xff]  }
  0x50   :  { %1282 = vmatpush1.bf16.msra.mxu0 %v2337_v0  ;;  %1446 = vmatpush1.bf16.msra.mxu1 %v2338_v1  ;;  %v2423_v0 = vld [vmem:[#allocation2 + $0x3c0] ss:$16 sps:$4 sm:$0xff]   ;;  %v2426_v1 = vld [vmem:[#allocation2 + $0x3c8] ss:$16 sps:$4 sm:$0xff]  }
  0x51   :  { %1292 = vmatprep.subr.bf16.mxu0 %v2341_v3  ;;  %1456 = vmatprep.subr.bf16.mxu1 %v2344_v4  ;;  %v2434_v3 = vld [vmem:[#allocation2 + $0x3ec] ss:$16 sps:$4 sm:$0xff]   ;;  %v2429_v4 = vld [vmem:[#allocation2 + $0x3e0] ss:$16 sps:$4 sm:$0xff]  }
  0x53   :  { %1284 = vmatmul.mubr.bf16.vlgmr.msra.gmra.mrb[0].mxu0 %v42_v5  ;;  %1448 = vmatmul.mubr.bf16.vlgmr.msra.gmra.mrb[0].mxu1 %v42_v5  ;;  %v2432_v5 = vld [vmem:[#allocation2 + $0x3e8] ss:$16 sps:$4 sm:$0xff]  }
  0x54   :  { %1293 = vmatpush1.bf16.msra.mxu0 %v2339_v6  ;;  %1457 = vmatpush1.bf16.msra.mxu1 %v2342_v7  ;;  %v2437_v6 = vld [vmem:[#allocation2 + $0x404] ss:$16 sps:$4 sm:$0xff]  }
  0x55   :  { %1294 = vmatprep.subr.bf16.mxu0 %v2347_v8  ;;  %1458 = vmatprep.subr.bf16.mxu1 %v2350_v9  ;;  %v37_v7 = vld [vmem:[%s2765_s0 + $0x10] sm:$0xff]  ;;  %v2440_v8 = vld [vmem:[#allocation2 + $0x40c] ss:$16 sps:$4 sm:$0xff]  }
  0x56   :  { %1324 = vmatprep.mubr.bf16.mxu0 %v45_v32  ;;  %1488 = vmatprep.mubr.bf16.mxu1 %v45_v32  ;;  %v2435_v9 = vld [vmem:[#allocation2 + $0x400] ss:$16 sps:$4 sm:$0xff]  }
  0x57   :  { %v2465_v32 = vld [vmem:[#allocation2 + $0x4a0] ss:$16 sps:$4 sm:$0xff]  }
  0x58   :  { %1295 = vmatpush1.bf16.msra.mxu0 %v2345_v10  ;;  %1459 = vmatpush1.bf16.msra.mxu1 %v2348_v11  ;;  %v44_v10 = vpack.c.bf16 %v37_v7, %v37_v7  ;;  %v2438_v11 = vld [vmem:[#allocation2 + $0x408] ss:$16 sps:$4 sm:$0xff]   ;;  %v2530_v7 = vld [vmem:[#allocation2 + $0x5ec] ss:$16 sps:$4 sm:$0xff]  }
  0x59   :  { %1296 = vmatprep.subr.bf16.mxu0 %v2353_v12  ;;  %1460 = vmatprep.subr.bf16.mxu1 %v2356_v13  ;;  %v2443_v12 = vld [vmem:[#allocation2 + $0x424] ss:$16 sps:$4 sm:$0xff]   ;;  %v2446_v13 = vld [vmem:[#allocation2 + $0x42c] ss:$16 sps:$4 sm:$0xff]  }
  0x5c   :  { %1297 = vmatpush1.bf16.msra.mxu0 %v2351_v14  ;;  %1461 = vmatpush1.bf16.msra.mxu1 %v2354_v15  ;;  %v40_v14 = vld [vmem:[%s2765_s0 + $0x28] sm:$0xff] }
  0x5d   :  { %1298 = vmatprep.subr.bf16.mxu0 %v2359_v16  ;;  %1462 = vmatprep.subr.bf16.mxu1 %v2362_v17  ;;  %v47_v15 = vpack.c.bf16 %v40_v14, %v40_v14  ;;  %v2441_v16 = vld [vmem:[#allocation2 + $0x420] ss:$16 sps:$4 sm:$0xff]   ;;  %v2444_v17 = vld [vmem:[#allocation2 + $0x428] ss:$16 sps:$4 sm:$0xff]  }
  0x5e   :  { %v2531_v14 = vld [vmem:[#allocation2 + $0x600] ss:$16 sps:$4 sm:$0xff]  }
  0x60   :  { %1299 = vmatpush1.bf16.msra.mxu0 %v2357_v18  ;;  %1463 = vmatpush1.bf16.msra.mxu1 %v2360_v19  ;;  %v2449_v18 = vld [vmem:[#allocation2 + $0x444] ss:$16 sps:$4 sm:$0xff]   ;;  %v2452_v19 = vld [vmem:[#allocation2 + $0x44c] ss:$16 sps:$4 sm:$0xff]  }
  0x61   :  { %1300 = vmatprep.subr.bf16.mxu0 %v2365_v20  ;;  %1464 = vmatprep.subr.bf16.mxu1 %v2368_v21  ;;  %v2447_v20 = vld [vmem:[#allocation2 + $0x440] ss:$16 sps:$4 sm:$0xff]   ;;  %v2450_v21 = vld [vmem:[#allocation2 + $0x448] ss:$16 sps:$4 sm:$0xff]  }
  0x64   :  { %1301 = vmatpush1.bf16.msra.mxu0 %v2363_v22  ;;  %1465 = vmatpush1.bf16.msra.mxu1 %v2366_v23  ;;  %v2455_v22 = vld [vmem:[#allocation2 + $0x464] ss:$16 sps:$4 sm:$0xff]   ;;  %v2458_v23 = vld [vmem:[#allocation2 + $0x46c] ss:$16 sps:$4 sm:$0xff]  }
  0x65   :  { %1302 = vmatprep.subr.bf16.mxu0 %v2371_v24  ;;  %1466 = vmatprep.subr.bf16.mxu1 %v2374_v25  ;;  %v2453_v24 = vld [vmem:[#allocation2 + $0x460] ss:$16 sps:$4 sm:$0xff]   ;;  %v2456_v25 = vld [vmem:[#allocation2 + $0x468] ss:$16 sps:$4 sm:$0xff]  }
  0x68   :  { %1303 = vmatpush1.bf16.msra.mxu0 %v2369_v26  ;;  %1467 = vmatpush1.bf16.msra.mxu1 %v2372_v27  ;;  %v2461_v26 = vld [vmem:[#allocation2 + $0x484] ss:$16 sps:$4 sm:$0xff]   ;;  %v2464_v27 = vld [vmem:[#allocation2 + $0x48c] ss:$16 sps:$4 sm:$0xff]  }
  0x69   :  { %1304 = vmatprep.subr.bf16.mxu0 %v2377_v28  ;;  %1468 = vmatprep.subr.bf16.mxu1 %v2380_v29  ;;  %v2459_v28 = vld [vmem:[#allocation2 + $0x480] ss:$16 sps:$4 sm:$0xff]   ;;  %v2462_v29 = vld [vmem:[#allocation2 + $0x488] ss:$16 sps:$4 sm:$0xff]  }
  0x6c   :  { %1305 = vmatpush1.bf16.msra.mxu0 %v2375_v31  ;;  %1469 = vmatpush1.bf16.msra.mxu1 %v2378_v33  ;;  %v2470_v31 = vld [vmem:[#allocation2 + $0x4ac] ss:$16 sps:$4 sm:$0xff]   ;;  %v2468_v33 = vld [vmem:[#allocation2 + $0x4a8] ss:$16 sps:$4 sm:$0xff]  }
  0x6d   :  { %1306 = vmatprep.subr.bf16.mxu0 %v2383_v34  ;;  %1470 = vmatprep.subr.bf16.mxu1 %v2386_v35  ;;  %v2473_v34 = vld [vmem:[#allocation2 + $0x4c4] ss:$16 sps:$4 sm:$0xff]   ;;  %v2476_v35 = vld [vmem:[#allocation2 + $0x4cc] ss:$16 sps:$4 sm:$0xff]  }
  0x70   :  { %1307 = vmatpush1.bf16.msra.mxu0 %v2381_v36  ;;  %1471 = vmatpush1.bf16.msra.mxu1 %v2384_v37  ;;  %v2471_v36 = vld [vmem:[#allocation2 + $0x4c0] ss:$16 sps:$4 sm:$0xff]   ;;  %v2474_v37 = vld [vmem:[#allocation2 + $0x4c8] ss:$16 sps:$4 sm:$0xff]  }
  0x71   :  { %1308 = vmatprep.subr.bf16.mxu0 %v2389_v38  ;;  %1472 = vmatprep.subr.bf16.mxu1 %v2392_v39  ;;  %v2479_v38 = vld [vmem:[#allocation2 + $0x4e4] ss:$16 sps:$4 sm:$0xff]   ;;  %v2482_v39 = vld [vmem:[#allocation2 + $0x4ec] ss:$16 sps:$4 sm:$0xff]  }
  0x74   :  { %1309 = vmatpush1.bf16.msra.mxu0 %v2387_v40  ;;  %1473 = vmatpush1.bf16.msra.mxu1 %v2390_v41  ;;  %v2477_v40 = vld [vmem:[#allocation2 + $0x4e0] ss:$16 sps:$4 sm:$0xff]   ;;  %v2480_v41 = vld [vmem:[#allocation2 + $0x4e8] ss:$16 sps:$4 sm:$0xff]  }
  0x75   :  { %1310 = vmatprep.subr.bf16.mxu0 %v2395_v42  ;;  %1474 = vmatprep.subr.bf16.mxu1 %v2398_v43  ;;  %v2485_v42 = vld [vmem:[#allocation2 + $0x504] ss:$16 sps:$4 sm:$0xff]   ;;  %v2488_v43 = vld [vmem:[#allocation2 + $0x50c] ss:$16 sps:$4 sm:$0xff]  }
  0x78   :  { %1311 = vmatpush1.bf16.msra.mxu0 %v2393_v44  ;;  %1475 = vmatpush1.bf16.msra.mxu1 %v2396_v45  ;;  %v2483_v44 = vld [vmem:[#allocation2 + $0x500] ss:$16 sps:$4 sm:$0xff]   ;;  %v2486_v45 = vld [vmem:[#allocation2 + $0x508] ss:$16 sps:$4 sm:$0xff]  }
  0x79   :  { %1312 = vmatprep.subr.bf16.mxu0 %v2401_v46  ;;  %1476 = vmatprep.subr.bf16.mxu1 %v2404_v47  ;;  %v2491_v46 = vld [vmem:[#allocation2 + $0x524] ss:$16 sps:$4 sm:$0xff]   ;;  %v2494_v47 = vld [vmem:[#allocation2 + $0x52c] ss:$16 sps:$4 sm:$0xff]  }
  0x7c   :  { %1313 = vmatpush1.bf16.msra.mxu0 %v2399_v48  ;;  %1477 = vmatpush1.bf16.msra.mxu1 %v2402_v49  ;;  %v2489_v48 = vld [vmem:[#allocation2 + $0x520] ss:$16 sps:$4 sm:$0xff]   ;;  %v2492_v49 = vld [vmem:[#allocation2 + $0x528] ss:$16 sps:$4 sm:$0xff]  }
  0x7d   :  { %1314 = vmatprep.subr.bf16.mxu0 %v2407_v50  ;;  %1478 = vmatprep.subr.bf16.mxu1 %v2410_v51  ;;  %v2497_v50 = vld [vmem:[#allocation2 + $0x544] ss:$16 sps:$4 sm:$0xff]   ;;  %v2500_v51 = vld [vmem:[#allocation2 + $0x54c] ss:$16 sps:$4 sm:$0xff]  }
  0x80   :  { %1315 = vmatpush1.bf16.msra.mxu0 %v2405_v52  ;;  %1479 = vmatpush1.bf16.msra.mxu1 %v2408_v53  ;;  %v2495_v52 = vld [vmem:[#allocation2 + $0x540] ss:$16 sps:$4 sm:$0xff]   ;;  %v2498_v53 = vld [vmem:[#allocation2 + $0x548] ss:$16 sps:$4 sm:$0xff]  }
  0x81   :  { %1316 = vmatprep.subr.bf16.mxu0 %v2413_v54  ;;  %1480 = vmatprep.subr.bf16.mxu1 %v2416_v55  ;;  %v2503_v54 = vld [vmem:[#allocation2 + $0x564] ss:$16 sps:$4 sm:$0xff]   ;;  %v2506_v55 = vld [vmem:[#allocation2 + $0x56c] ss:$16 sps:$4 sm:$0xff]  }
  0x84   :  { %1317 = vmatpush1.bf16.msra.mxu0 %v2411_v56  ;;  %1481 = vmatpush1.bf16.msra.mxu1 %v2414_v57  ;;  %v2501_v56 = vld [vmem:[#allocation2 + $0x560] ss:$16 sps:$4 sm:$0xff]   ;;  %v2504_v57 = vld [vmem:[#allocation2 + $0x568] ss:$16 sps:$4 sm:$0xff]  }
  0x85   :  { %1318 = vmatprep.subr.bf16.mxu0 %v2419_v58  ;;  %1482 = vmatprep.subr.bf16.mxu1 %v2422_v59  ;;  %v2509_v58 = vld [vmem:[#allocation2 + $0x584] ss:$16 sps:$4 sm:$0xff]   ;;  %v2512_v59 = vld [vmem:[#allocation2 + $0x58c] ss:$16 sps:$4 sm:$0xff]  }
  0x88   :  { %1319 = vmatpush1.bf16.msra.mxu0 %v2417_v60  ;;  %1483 = vmatpush1.bf16.msra.mxu1 %v2420_v61  ;;  %v2507_v60 = vld [vmem:[#allocation2 + $0x580] ss:$16 sps:$4 sm:$0xff]   ;;  %v2510_v61 = vld [vmem:[#allocation2 + $0x588] ss:$16 sps:$4 sm:$0xff]  }
  0x89   :  { %1320 = vmatprep.subr.bf16.mxu0 %v2425_v62  ;;  %1484 = vmatprep.subr.bf16.mxu1 %v2428_v63  ;;  %v2515_v62 = vld [vmem:[#allocation2 + $0x5a4] ss:$16 sps:$4 sm:$0xff]   ;;  %v2518_v63 = vld [vmem:[#allocation2 + $0x5ac] ss:$16 sps:$4 sm:$0xff]  }
  0x8c   :  { %1321 = vmatpush1.bf16.msra.mxu0 %v2423_v0  ;;  %1485 = vmatpush1.bf16.msra.mxu1 %v2426_v1  ;;  %v2513_v0 = vld [vmem:[#allocation2 + $0x5a0] ss:$16 sps:$4 sm:$0xff]   ;;  %v2516_v1 = vld [vmem:[#allocation2 + $0x5a8] ss:$16 sps:$4 sm:$0xff]  }
  0x8d   :  { %1322 = vmatprep.subr.bf16.mxu0 %v2431_v2  ;;  %1486 = vmatprep.subr.bf16.mxu1 %v2434_v3  ;;  %v2521_v2 = vld [vmem:[#allocation2 + $0x5c4] ss:$16 sps:$4 sm:$0xff]   ;;  %v2524_v3 = vld [vmem:[#allocation2 + $0x5cc] ss:$16 sps:$4 sm:$0xff]  }
  0x90   :  { %1323 = vmatpush1.bf16.msra.mxu0 %v2429_v4  ;;  %1487 = vmatpush1.bf16.msra.mxu1 %v2432_v5  ;;  %v2519_v4 = vld [vmem:[#allocation2 + $0x5c0] ss:$16 sps:$4 sm:$0xff]   ;;  %v2522_v5 = vld [vmem:[#allocation2 + $0x5c8] ss:$16 sps:$4 sm:$0xff]  }
  0x91   :  { %1333 = vmatprep.subr.bf16.mxu0 %v2437_v6  ;;  %1497 = vmatprep.subr.bf16.mxu1 %v2440_v8  ;;  %v2527_v6 = vld [vmem:[#allocation2 + $0x5e4] ss:$16 sps:$4 sm:$0xff]   ;;  %v2525_v8 = vld [vmem:[#allocation2 + $0x5e0] ss:$16 sps:$4 sm:$0xff]  }
  0x93   :  { %1325 = vmatmul.mubr.bf16.vlgmr.msra.gmra.mrb[0].mxu0 %v44_v10  ;;  %1489 = vmatmul.mubr.bf16.vlgmr.msra.gmra.mrb[0].mxu1 %v44_v10  ;;  %v39_v10 = vld [vmem:[%s2765_s0 + $0x20] sm:$0xff] }
  0x94   :  { %1334 = vmatpush1.bf16.msra.mxu0 %v2435_v9  ;;  %1498 = vmatpush1.bf16.msra.mxu1 %v2438_v11  ;;  %v2528_v9 = vld [vmem:[#allocation2 + $0x5e8] ss:$16 sps:$4 sm:$0xff]   ;;  %v2533_v11 = vld [vmem:[#allocation2 + $0x604] ss:$16 sps:$4 sm:$0xff]  }
  0x95   :  { %1335 = vmatprep.subr.bf16.mxu0 %v2443_v12  ;;  %1499 = vmatprep.subr.bf16.mxu1 %v2446_v13  ;;  %v2536_v12 = vld [vmem:[#allocation2 + $0x60c] ss:$16 sps:$4 sm:$0xff]   ;;  %v46_v13 = vpack.c.bf16 %v39_v10, %v39_v10 }
  0x96   :  { %1365 = vmatprep.mubr.bf16.mxu0 %v47_v15  ;;  %1529 = vmatprep.mubr.bf16.mxu1 %v47_v15  ;;  %v2534_v15 = vld [vmem:[#allocation2 + $0x608] ss:$16 sps:$4 sm:$0xff]  }
  0x98   :  { %1336 = vmatpush1.bf16.msra.mxu0 %v2441_v16  ;;  %1500 = vmatpush1.bf16.msra.mxu1 %v2444_v17  ;;  %v2537_v16 = vld [vmem:[%s2768_s3 + $0x40] sm:$0xff]  }
  0x99   :  { %1337 = vmatprep.subr.bf16.mxu0 %v2449_v18  ;;  %1501 = vmatprep.subr.bf16.mxu1 %v2452_v19  ;;  %v2538_v17 = vld [vmem:[%s2768_s3 + $0xc0] sm:$0xff]   ;;  %v2596_v18 = vmov 0   ;;  %v41_v19 = vld [vmem:[%s2765_s0 + $0x30] sm:$0xff] }
  0x9c   :  { %1338 = vmatpush1.bf16.msra.mxu0 %v2447_v20  ;;  %1502 = vmatpush1.bf16.msra.mxu1 %v2450_v21  ;;  %v48_v20 = vpack.c.bf16 %v41_v19, %v41_v19  ;;  %v2539_v21 = vld [vmem:[%s2768_s3] sm:$0xff]  }
  0x9d   :  { %1339 = vmatprep.subr.bf16.mxu0 %v2455_v22  ;;  %1503 = vmatprep.subr.bf16.mxu1 %v2458_v23  ;;  %v2540_v22 = vld [vmem:[%s2768_s3 + $0x80] sm:$0xff]   ;;  %v2541_v23 = vld [vmem:[%s2768_s3 + $0x48] sm:$0xff]  }
  0xa0   :  { %1340 = vmatpush1.bf16.msra.mxu0 %v2453_v24  ;;  %1504 = vmatpush1.bf16.msra.mxu1 %v2456_v25  ;;  %v2542_v24 = vld [vmem:[%s2768_s3 + $0xc8] sm:$0xff]  }
  0xa1   :  { %1341 = vmatprep.subr.bf16.mxu0 %v2461_v26  ;;  %1505 = vmatprep.subr.bf16.mxu1 %v2464_v27  ;;  %v2543_v25 = vld [vmem:[%s2768_s3 + $0x8] sm:$0xff]   ;;  %v2545_v27 = vld [vmem:[%s2768_s3 + $0x50] sm:$0xff]  }
  0xa2   :  { %v2544_v26 = vld [vmem:[%s2768_s3 + $0x88] sm:$0xff]  }
  0xa4   :  { %1342 = vmatpush1.bf16.msra.mxu0 %v2459_v28  ;;  %1506 = vmatpush1.bf16.msra.mxu1 %v2462_v29  ;;  %v2546_v28 = vld [vmem:[%s2768_s3 + $0xd0] sm:$0xff]  }
  0xa5   :  { %1343 = vmatprep.subr.bf16.mxu0 %v2467_v30  ;;  %1507 = vmatprep.subr.bf16.mxu1 %v2470_v31  ;;  %v2547_v29 = vld [vmem:[%s2768_s3 + $0x10] sm:$0xff]   ;;  %v2549_v31 = vld [vmem:[%s2768_s3 + $0x58] sm:$0xff]  }
  0xa6   :  { %v2548_v30 = vld [vmem:[%s2768_s3 + $0x90] sm:$0xff]  }
  0xa8   :  { %1344 = vmatpush1.bf16.msra.mxu0 %v2465_v32  ;;  %1508 = vmatpush1.bf16.msra.mxu1 %v2468_v33  ;;  %v2550_v32 = vld [vmem:[%s2768_s3 + $0xd8] sm:$0xff]  }
  0xa9   :  { %1345 = vmatprep.subr.bf16.mxu0 %v2473_v34  ;;  %1509 = vmatprep.subr.bf16.mxu1 %v2476_v35  ;;  %v2551_v33 = vld [vmem:[%s2768_s3 + $0x18] sm:$0xff]   ;;  %v2553_v35 = vld [vmem:[%s2768_s3 + $0x60] sm:$0xff]  }
  0xaa   :  { %v2552_v34 = vld [vmem:[%s2768_s3 + $0x98] sm:$0xff]  }
  0xac   :  { %1346 = vmatpush1.bf16.msra.mxu0 %v2471_v36  ;;  %1510 = vmatpush1.bf16.msra.mxu1 %v2474_v37  ;;  %v2554_v36 = vld [vmem:[%s2768_s3 + $0xe0] sm:$0xff]  }
  0xad   :  { %1347 = vmatprep.subr.bf16.mxu0 %v2479_v38  ;;  %1511 = vmatprep.subr.bf16.mxu1 %v2482_v39  ;;  %v2555_v37 = vld [vmem:[%s2768_s3 + $0x20] sm:$0xff]   ;;  %v2557_v39 = vld [vmem:[%s2768_s3 + $0x68] sm:$0xff]  }
  0xae   :  { %v2556_v38 = vld [vmem:[%s2768_s3 + $0xa0] sm:$0xff]  }
  0xb0   :  { %1348 = vmatpush1.bf16.msra.mxu0 %v2477_v40  ;;  %1512 = vmatpush1.bf16.msra.mxu1 %v2480_v41  ;;  %v2558_v40 = vld [vmem:[%s2768_s3 + $0xe8] sm:$0xff]  }
  0xb1   :  { %1349 = vmatprep.subr.bf16.mxu0 %v2485_v42  ;;  %1513 = vmatprep.subr.bf16.mxu1 %v2488_v43  ;;  %v2559_v41 = vld [vmem:[%s2768_s3 + $0x28] sm:$0xff]   ;;  %v2561_v43 = vld [vmem:[%s2768_s3 + $0x70] sm:$0xff]  }
  0xb2   :  { %v2560_v42 = vld [vmem:[%s2768_s3 + $0xa8] sm:$0xff]  }
  0xb4   :  { %1350 = vmatpush1.bf16.msra.mxu0 %v2483_v44  ;;  %1514 = vmatpush1.bf16.msra.mxu1 %v2486_v45  ;;  %v2562_v44 = vld [vmem:[%s2768_s3 + $0xf0] sm:$0xff]  }
  0xb5   :  { %1351 = vmatprep.subr.bf16.mxu0 %v2491_v46  ;;  %1515 = vmatprep.subr.bf16.mxu1 %v2494_v47  ;;  %v2563_v45 = vld [vmem:[%s2768_s3 + $0x30] sm:$0xff]   ;;  %v2565_v47 = vld [vmem:[%s2768_s3 + $0x78] sm:$0xff]  }
  0xb6   :  { %v2564_v46 = vld [vmem:[%s2768_s3 + $0xb0] sm:$0xff]  }
  0xb8   :  { %1352 = vmatpush1.bf16.msra.mxu0 %v2489_v48  ;;  %1516 = vmatpush1.bf16.msra.mxu1 %v2492_v49  ;;  %v2566_v48 = vld [vmem:[%s2768_s3 + $0xf8] sm:$0xff]  }
  0xb9   :  { %1353 = vmatprep.subr.bf16.mxu0 %v2497_v50  ;;  %1517 = vmatprep.subr.bf16.mxu1 %v2500_v51  ;;  %v2567_v49 = vld [vmem:[%s2768_s3 + $0x38] sm:$0xff]   ;;  %v247_v51 = vlaneseq }
  0xba   :  { %v2568_v50 = vld [vmem:[%s2768_s3 + $0xb8] sm:$0xff]  }
  0xbc   :  { %1354 = vmatpush1.bf16.msra.mxu0 %v2495_v52  ;;  %1518 = vmatpush1.bf16.msra.mxu1 %v2498_v53  ;;  %v248_v52 = vshrl.u32 %v247_v51, 7 }
  0xbd   :  { %1355 = vmatprep.subr.bf16.mxu0 %v2503_v54  ;;  %1519 = vmatprep.subr.bf16.mxu1 %v2506_v55  ;;  %v245_v55 = vld [vmem:[%s2767_s2] sm:$0xf] }
  0xbe   :  { %v249_v53 = vsub.s32 0, %v248_v52  ;;  %v257_v54 = vsub.s32 2, %v248_v52 }
  0xc0   :  { %1356 = vmatpush1.bf16.msra.mxu0 %v2501_v56  ;;  %1520 = vmatpush1.bf16.msra.mxu1 %v2504_v57  ;;  %v253_v56 = vsub.s32 1, %v248_v52  ;;  %v261_v57 = vsub.s32 3, %v248_v52 }
  0xc1   :  { %1357 = vmatprep.subr.bf16.mxu0 %v2509_v58  ;;  %1521 = vmatprep.subr.bf16.mxu1 %v2512_v59  ;;  %v250_v58 = vrot.slane %v245_v55, %v249_v53  ;;  %v258_v59 = vrot.slane %v245_v55, %v257_v54 }
  0xc4   :  { %1358 = vmatpush1.bf16.msra.mxu0 %v2507_v60  ;;  %1522 = vmatpush1.bf16.msra.mxu1 %v2510_v61  ;;  %v254_v60 = vrot.slane %v245_v55, %v253_v56  ;;  %v262_v61 = vrot.slane %v245_v55, %v261_v57 }
  0xc5   :  { %1359 = vmatprep.subr.bf16.mxu0 %v2515_v62  ;;  %1523 = vmatprep.subr.bf16.mxu1 %v2518_v63 }
  0xc8   :  { %1360 = vmatpush1.bf16.msra.mxu0 %v2513_v0  ;;  %1524 = vmatpush1.bf16.msra.mxu1 %v2516_v1 }
  0xc9   :  { %1361 = vmatprep.subr.bf16.mxu0 %v2521_v2  ;;  %1525 = vmatprep.subr.bf16.mxu1 %v2524_v3 }
  0xcc   :  { %1362 = vmatpush1.bf16.msra.mxu0 %v2519_v4  ;;  %1526 = vmatpush1.bf16.msra.mxu1 %v2522_v5 }
  0xcd   :  { %1363 = vmatprep.subr.bf16.mxu0 %v2527_v6  ;;  %1527 = vmatprep.subr.bf16.mxu1 %v2530_v7 }
  0xd0   :  { %1364 = vmatpush1.bf16.msra.mxu0 %v2525_v8  ;;  %1528 = vmatpush1.bf16.msra.mxu1 %v2528_v9 }
  0xd1   :  { %1374 = vmatprep.subr.bf16.mxu0 %v2533_v11  ;;  %1538 = vmatprep.subr.bf16.mxu1 %v2536_v12 }
  0xd3   :  { %1366 = vmatmul.mubr.bf16.vlgmr.msra.gmra.mrb[0].mxu0 %v46_v13  ;;  %1530 = vmatmul.mubr.bf16.vlgmr.msra.gmra.mrb[0].mxu1 %v46_v13 }
  0xd4   :  { %1375 = vmatpush1.bf16.msra.mxu0 %v2531_v14  ;;  %1539 = vmatpush1.bf16.msra.mxu1 %v2534_v15 }
  0xd5   :  { %1406 = vmatprep.mubr.bf16.mxu0 %v2596_v18  ;;  %1570 = vmatprep.mubr.bf16.mxu1 %v2596_v18 }
  0xd6   :  { %2167 = vmatprep.subr.bf16.mxu0 %v2537_v16  ;;  %2189 = vmatprep.subr.bf16.mxu1 %v2538_v17 }
  0xdf   :  { %2132 = vmatmul.mubr.msk.bf16.vlgmr.msra.gmra.mrb[0].mxu0 %vm1247_vm0, %v48_v20  ;;  %2133 = vmatmul.mubr.msk.bf16.vlgmr.msra.gmra.mrb[0].mxu1 %vm1247_vm0, %v48_v20  ;;  %v2134_v20 = vld [vmem:[%s2769_s4] ss:$0 sm:$0xff] }
  0xe0   :  { %2168 = vmatpush3.bf16.msra.mxu0 %v2539_v21  ;;  %2190 = vmatpush3.bf16.msra.mxu1 %v2540_v22 }
  0xe1   :  { %2169 = vmatprep.subr.bf16.mxu0 %v2541_v23  ;;  %2191 = vmatprep.subr.bf16.mxu1 %v2542_v24 }
  0xe4   :  { %2170 = vmatpush3.bf16.msra.mxu0 %v2543_v25  ;;  %2192 = vmatpush3.bf16.msra.mxu1 %v2544_v26 }
  0xe5   :  { %2171 = vmatprep.subr.bf16.mxu0 %v2545_v27  ;;  %2193 = vmatprep.subr.bf16.mxu1 %v2546_v28 }
  0xe8   :  { %2172 = vmatpush3.bf16.msra.mxu0 %v2547_v29  ;;  %2194 = vmatpush3.bf16.msra.mxu1 %v2548_v30 }
  0xe9   :  { %2173 = vmatprep.subr.bf16.mxu0 %v2549_v31  ;;  %2195 = vmatprep.subr.bf16.mxu1 %v2550_v32 }
  0xec   :  { %2174 = vmatpush3.bf16.msra.mxu0 %v2551_v33  ;;  %2196 = vmatpush3.bf16.msra.mxu1 %v2552_v34 }
  0xed   :  { %2175 = vmatprep.subr.bf16.mxu0 %v2553_v35  ;;  %2197 = vmatprep.subr.bf16.mxu1 %v2554_v36 }
  0xf0   :  { %2176 = vmatpush3.bf16.msra.mxu0 %v2555_v37  ;;  %2198 = vmatpush3.bf16.msra.mxu1 %v2556_v38 }
  0xf1   :  { %2177 = vmatprep.subr.bf16.mxu0 %v2557_v39  ;;  %2199 = vmatprep.subr.bf16.mxu1 %v2558_v40 }
  0xf4   :  { %2178 = vmatpush3.bf16.msra.mxu0 %v2559_v41  ;;  %2200 = vmatpush3.bf16.msra.mxu1 %v2560_v42 }
  0xf5   :  { %2179 = vmatprep.subr.bf16.mxu0 %v2561_v43  ;;  %2201 = vmatprep.subr.bf16.mxu1 %v2562_v44 }
  0xf8   :  { %2180 = vmatpush3.bf16.msra.mxu0 %v2563_v45  ;;  %2202 = vmatpush3.bf16.msra.mxu1 %v2564_v46 }
  0xf9   :  { %2181 = vmatprep.subr.bf16.mxu0 %v2565_v47  ;;  %2203 = vmatprep.subr.bf16.mxu1 %v2566_v48 }
  0xfc   :  { %2182 = vmatpush3.bf16.msra.mxu0 %v2567_v49  ;;  %2204 = vmatpush3.bf16.msra.mxu1 %v2568_v50 }
 0x1b2   :  { %v1408_v62 = vpop.f32.mrb[0].mxu0  ;;  %v1572_v63 = vpop.f32.mrb[0].mxu1 }
 0x1b3   :  { %v2211_v0 = vadd.f32 %v1408_v62, %v250_v58  ;;  %v2213_v1 = vadd.f32 %v1572_v63, %v258_v59  ;;  %v1410_v2 = vpop.f32.mrb[1].mxu0  ;;  %v1574_v3 = vpop.f32.mrb[1].mxu1 }
 0x1b4   :  { %v2212_v4 = vadd.f32 %v1410_v2, %v254_v60  ;;  %v2214_v5 = vadd.f32 %v1574_v3, %v262_v61  ;;  %v1412_v6 = vpop.f32.mrb[2].mxu0  ;;  %v1576_v7 = vpop.f32.mrb[2].mxu1 }
 0x1b5   :  { %v1579_v8 = vmax.f32 %v2211_v0, 0.0  ;;  %v1581_v9 = vmax.f32 %v2213_v1, 0.0  ;;  %v1413_v10 = vpop.f32.mrb[3].mxu0  ;;  %v1577_v11 = vpop.f32.mrb[3].mxu1 }
 0x1b6   :  { %v1580_v12 = vmax.f32 %v2212_v4, 0.0  ;;  %v1582_v13 = vmax.f32 %v2214_v5, 0.0 }
 0x1b7   :  { %v1583_v16 = vpack.c.bf16 %v1579_v8, %v1579_v8  ;;  %v1585_v17 = vpack.c.bf16 %v1581_v9, %v1581_v9 }
 0x1b8   :  { %v1584_v14 = vpack.c.bf16 %v1580_v12, %v1580_v12  ;;  %v1586_v15 = vpack.c.bf16 %v1582_v13, %v1582_v13 }
 0x1ba   :  { %1882 = vmatprep.mubr.bf16.mxu0 %v1584_v14  ;;  %1922 = vmatprep.mubr.bf16.mxu1 %v1586_v15 }
 0x1bb   :  { %1883 = vmatmul.mubr.bf16.vlgmr.msra.gmra.mrb[4].mxu0 %v1583_v16  ;;  %1923 = vmatmul.mubr.bf16.vlgmr.msra.gmra.mrb[4].mxu1 %v1585_v17 }
 0x28e   :  { %v2183_v18 = vpop.f32.mrb[4].mxu0  ;;  %v2205_v19 = vpop.f32.mrb[4].mxu1 }
 0x28f   :  { %v2184_v21 = vpop.f32.mrb[5].mxu0  ;;  %v2206_v22 = vpop.f32.mrb[5].mxu1 }
 0x290   :  { %v2185_v23 = vadd.f32 %v2184_v21, %v2183_v18  ;;  %v2207_v24 = vadd.f32 %v2206_v22, %v2205_v19  ;;  %v2186_v25 = vpop.f32.mrb[6].mxu0  ;;  %v2208_v26 = vpop.f32.mrb[6].mxu1 }
 0x291   :  { %v2187_v27 = vpop.f32.mrb[7].mxu0  ;;  %v2209_v28 = vpop.f32.mrb[7].mxu1 }
 0x292   :  { %v1885_v29 = vadd.f32 %v2185_v23, %v2134_v20 }
 0x294   :  { %v1925_v30 = vadd.f32 %v2207_v24, %v1885_v29 }
 0x296   :  { %1930 = vst [vmem:[%s2770_s5] sm:$0xff] %v1925_v30 }
 0x297   :  { %1935 = vsyncpa [#allocation3], 1 }

</bundles_post_ra>
